<compile_context>
chip_gen: v7x
topology: tpu7x:2x2x1
jax: 0.10.0
libtpu: 0.0.40
codegen_flags: <defaults>
</compile_context>

<pallas_src>
import jax
import jax.numpy as jnp
from jax.experimental import pallas as pl
from jax.experimental.pallas import tpu as pltpu

LANE = 128
SUB = 8


def _round_up(v: int, m: int) -> int:
    return (v + m - 1) // m * m


def _make_kernel(eps: float, residual: bool):
    def kernel(x_tile_ref, msg_ref, tgt_ref, w1T_ref, b1_ref, *rest):
        if residual:
            wrT_ref, out_ref, agg_ref = rest
        else:
            out_ref, agg_ref = rest

        n_step = pl.program_id(0)          # node-tile index ("parallel")
        e_step = pl.program_id(1)          # edge-tile index ("arbitrary" reduction)
        tile_n = x_tile_ref.shape[0]

        # --- accumulator init: fuse the (1+eps)*x self term into it -------------
        @pl.when(e_step == 0)
        def _init():
            agg_ref[...] = (1.0 + eps) * x_tile_ref[...]

        # --- scatter-add via bf16 one-hot matmul on the MXU ---------------------
        # onehot_T[n, e] = (global_node_id(n) == tgt[e]); padded edges carry
        # tgt = -1 and therefore match nothing.  Build from a (tN, 1) iota vs the
        # (1, tE) tgt row so no (tN, tE) int32 temporary is materialized.
        node_ids = n_step * tile_n + jax.lax.broadcasted_iota(
            jnp.int32, (tile_n, 1), 0)
        onehot_T = (node_ids == tgt_ref[...]).astype(jnp.bfloat16)      # (tN, tE)
        agg_ref[...] += jnp.dot(onehot_T, msg_ref[...],
                                preferred_element_type=jnp.float32)

        # --- epilogue: nn (Linear + bias) -> ReLU -> optional residual ----------
        @pl.when(e_step == pl.num_programs(1) - 1)
        def _finalize():
            h = jnp.dot(agg_ref[...].astype(jnp.bfloat16), w1T_ref[...],
                        preferred_element_type=jnp.float32)
            h = jnp.maximum(h + b1_ref[...], 0.0)
            if residual:
                h = h + jnp.dot(x_tile_ref[...].astype(jnp.bfloat16), wrT_ref[...],
                                preferred_element_type=jnp.float32)
            out_ref[...] = h.astype(out_ref.dtype)

    return kernel


def _vmem_capacity_bytes() -> int:
    try:
        return int(pltpu.get_tpu_info().vmem_capacity_bytes)
    except Exception:
        return 64 << 20   # conservative fallback (v7x per-TC VMEM)


def _vmem_estimate(tN: int, tE: int, Cp: int, Op: int, residual: bool) -> int:
    """Rough VMEM footprint, including default double-buffering of every block."""
    b = 0
    b += 2 * tN * Cp * 4                                # x node tile (f32)
    b += 2 * tE * Cp * 2                                # message slab (bf16)
    b += 2 * SUB * tE * 4                               # tgt row (sublane padded)
    b += 2 * Cp * Op * 2 * (2 if residual else 1)       # nn / residual weights (bf16)
    b += 2 * SUB * Op * 4                               # bias
    b += 2 * tN * Op * 4                                # output tile
    b += tN * Cp * 4                                    # accumulator scratch
    b += tN * tE * 2 + tN * Op * 4 + tN * Cp * 4        # one-hot / h temporaries
    return b


def res_graph_module(x, edge_index, edge_attr, params, *, eps=1e-5, residual=True,
                     edge_tile=512, max_node_tile=1024):
    """Pallas forward pass matching ResGraphModule(in, out, edge, residual)."""
    N, Cin = x.shape
    E, Ce = edge_attr.shape
    Cout = params["W1"].shape[0]

    Cp = _round_up(Cin, LANE)          # padded node-feature width
    Op = _round_up(Cout, LANE)         # padded output width

    # --- edge tile: default 512 (MXU-friendly contraction), adapts to small E ---
    tE = max(LANE, _round_up(min(edge_tile, max(E, 1)), LANE))

    # --- node tile: split the "parallel" axis so nt >= 2 (v7x megacore) ---------
    Np0 = _round_up(max(N, 1), SUB)
    if Np0 > 2 * SUB:
        tN = min(max_node_tile, _round_up((Np0 + 1) // 2, SUB))
    else:
        tN = Np0

    # --- generation-aware VMEM budget: shrink tiles to fit (never under-declare) -
    capacity = _vmem_capacity_bytes()
    budget = max(32 << 20, int(capacity * 0.8))
    est = _vmem_estimate(tN, tE, Cp, Op, residual)
    while est > budget and (tE > LANE or tN > SUB):
        if tE > LANE:
            tE = max(LANE, _round_up(tE // 2, LANE))
        else:
            tN = max(SUB, _round_up(tN // 2, SUB))
        est = _vmem_estimate(tN, tE, Cp, Op, residual)
    vmem_limit = int(min(capacity, max(est + (4 << 20), 16 << 20)))

    Np = _round_up(Np0, tN)
    Ep = _round_up(max(E, 1), tE)
    nt, et = Np // tN, Ep // tE

    f32 = jnp.float32
    bf16 = jnp.bfloat16

    # --- hoisted edge path: gather + edge projection + ReLU done once in XLA ----
    src = edge_index[0].astype(jnp.int32)
    tgt_idx = edge_index[1].astype(jnp.int32)
    ea_p = edge_attr.astype(f32) @ params["We"].T.astype(f32)          # (E, Cin)
    msg = jnp.maximum(x.astype(f32)[src] + ea_p, 0.0)                  # (E, Cin)

    xp = jnp.zeros((Np, Cp), f32).at[:N, :Cin].set(x.astype(f32))
    msg_p = jnp.zeros((Ep, Cp), bf16).at[:E, :Cin].set(msg.astype(bf16))
    # Padded edges point at no node (-1) so they contribute nothing.
    tgt = jnp.full((1, Ep), -1, jnp.int32).at[0, :E].set(tgt_idx)

    w1T = jnp.zeros((Cp, Op), bf16).at[:Cin, :Cout].set(params["W1"].T.astype(bf16))
    b1 = jnp.zeros((1, Op), f32).at[0, :Cout].set(params["b1"].astype(f32))

    inputs = [xp, msg_p, tgt, w1T, b1]
    in_specs = [
        pl.BlockSpec((tN, Cp), lambda n, e: (n, 0)),    # x node tile (self / residual)
        pl.BlockSpec((tE, Cp), lambda n, e: (e, 0)),    # pre-fused bf16 messages (stream)
        pl.BlockSpec((1, tE), lambda n, e: (0, e)),     # tgt indices for this slab
        pl.BlockSpec((Cp, Op), lambda n, e: (0, 0)),    # nn weight (resident, bf16)
        pl.BlockSpec((1, Op), lambda n, e: (0, 0)),     # nn bias (resident)
    ]
    if residual:
        wrT = jnp.zeros((Cp, Op), bf16).at[:Cin, :Cout].set(params["Wr"].T.astype(bf16))
        inputs.append(wrT)
        in_specs.append(pl.BlockSpec((Cp, Op), lambda n, e: (0, 0)))

    flops = (2 * Np * Ep * Cp                                 # one-hot scatter matmuls
             + 2 * Np * Cp * Op * (2 if residual else 1))     # epilogue matmuls
    bytes_accessed = (nt * (Ep * Cp * 2 + Ep * 4)             # msg + tgt streams
                      + Np * Cp * 4 + Np * Op * 4             # x tiles + output
                      + Cp * Op * 2 * (2 if residual else 1) + Op * 4)

    out = pl.pallas_call(
        _make_kernel(float(eps), residual),
        out_shape=jax.ShapeDtypeStruct((Np, Op), f32),
        grid_spec=pltpu.PrefetchScalarGridSpec(
            num_scalar_prefetch=0,
            grid=(nt, et),
            in_specs=in_specs,
            out_specs=pl.BlockSpec((tN, Op), lambda n, e: (n, 0)),
            scratch_shapes=[pltpu.VMEM((tN, Cp), jnp.float32)],
        ),
        compiler_params=pltpu.CompilerParams(
            dimension_semantics=("parallel", "arbitrary"),
            vmem_limit_bytes=vmem_limit,
        ),
        cost_estimate=pl.CostEstimate(flops=flops, transcendentals=0,
                                      bytes_accessed=bytes_accessed),
    )(*inputs)

    return out[:N, :Cout]


def res_graph_module_ref(x, edge_index, edge_attr, params, *, eps=1e-5, residual=True):
    """Pure-JAX reference (mirrors torch_geometric GINEConv semantics)."""
    ea = edge_attr @ params["We"].T
    src, tgt = edge_index[0], edge_index[1]
    msg = jnp.maximum(x[src] + ea, 0.0)
    agg = jnp.zeros_like(x).at[tgt].add(msg)
    out = agg + (1.0 + eps) * x
    h = jnp.maximum(out @ params["W1"].T + params["b1"], 0.0)
    if residual:
        h = h + x @ params["Wr"].T
    return h


if __name__ == "__main__":
    # Small shapes consistent with the module: N nodes, E edges.
    N, E = 8, 16
    in_channels, out_channels, edge_channels = 16, 32, 8
    residual = True

    key = jax.random.PRNGKey(0)
    kx, ke, ksrc, ktgt, kwe, kw1, kb1, kwr = jax.random.split(key, 8)

    x = jax.random.normal(kx, (N, in_channels), dtype=jnp.float32)
    edge_attr = jax.random.normal(ke, (E, edge_channels), dtype=jnp.float32)
    edge_index = jnp.stack(
        [
            jax.random.randint(ksrc, (E,), 0, N),   # sources (x_j)
            jax.random.randint(ktgt, (E,), 0, N),   # targets (aggregation index)
        ],
        axis=0,
    ).astype(jnp.int32)

    # PyTorch Linear stores weight as [out, in].
    params = {
        "We": jax.random.normal(kwe, (in_channels, edge_channels), jnp.float32) * 0.1,
        "W1": jax.random.normal(kw1, (out_channels, in_channels), jnp.float32) * 0.1,
        "b1": jax.random.normal(kb1, (out_channels,), jnp.float32) * 0.1,
        "Wr": jax.random.normal(kwr, (out_channels, in_channels), jnp.float32) * 0.1,
    }

    out = res_graph_module(x, edge_index, edge_attr, params, eps=1e-5, residual=residual)
    out = jax.block_until_ready(out)

    ref = res_graph_module_ref(x, edge_index, edge_attr, params, eps=1e-5, residual=residual)
    assert out.shape == (N, out_channels)
    # bf16 message stream + bf16-operand matmuls (f32 accumulation) -> relaxed tolerance.
    max_err = jnp.max(jnp.abs(out - ref))
    assert jnp.allclose(out, ref, atol=3e-2, rtol=3e-2), f"mismatch vs reference: {max_err}"

    print("KERNEL_OK")
</pallas_src>

<mosaic_0001>
module attributes {stable_mosaic.version = 11 : i64} {
  func.func @kernel(%arg0: i32, %arg1: i32, %arg2: memref<8x128xf32, #tpu.memory_space<vmem>>, %arg3: memref<128x128xbf16, #tpu.memory_space<vmem>>, %arg4: memref<1x128xi32, #tpu.memory_space<vmem>>, %arg5: memref<128x128xbf16, #tpu.memory_space<vmem>>, %arg6: memref<1x128xf32, #tpu.memory_space<vmem>>, %arg7: memref<128x128xbf16, #tpu.memory_space<vmem>>, %arg8: memref<8x128xf32, #tpu.memory_space<vmem>>, %arg9: memref<8x128xf32, #tpu.memory_space<vmem>>) attributes {dimension_semantics = [#tpu.dimension_semantics<parallel>, #tpu.dimension_semantics<arbitrary>], iteration_bounds = array<i64: 1, 1>, scalar_prefetch = 0 : i64, scratch_operands = 1 : i64, tpu.core_type = #tpu.core_type<tc>, window_params = [{transform_indices = @transform_0, window_bounds = array<i64: 8, 128>}, {transform_indices = @transform_1, window_bounds = array<i64: 128, 128>}, {transform_indices = @transform_2, window_bounds = array<i64: 1, 128>}, {pipeline_mode = #tpu.pipeline_mode<synchronous>, transform_indices = @transform_3, window_bounds = array<i64: 128, 128>}, {pipeline_mode = #tpu.pipeline_mode<synchronous>, transform_indices = @transform_4, window_bounds = array<i64: 1, 128>}, {pipeline_mode = #tpu.pipeline_mode<synchronous>, transform_indices = @transform_5, window_bounds = array<i64: 128, 128>}, {transform_indices = @transform_6, window_bounds = array<i64: 8, 128>}]} {
    %c0_i32 = arith.constant 0 : i32
    %0 = arith.cmpi eq, %arg1, %c0_i32 : i32
    %1 = arith.extui %0 : i1 to i32
    %c0_i32_0 = arith.constant 0 : i32
    %2 = arith.cmpi ne, %1, %c0_i32_0 : i32
    scf.if %2 {
      %c0_10 = arith.constant 0 : index
      %c0_11 = arith.constant 0 : index
      %22 = vector.load %arg2[%c0_10, %c0_11] : memref<8x128xf32, #tpu.memory_space<vmem>>, vector<8x128xf32>
      %cst_12 = arith.constant 1.000010e+00 : f32
      %23 = vector.broadcast %cst_12 : f32 to vector<8x128xf32>
      %24 = arith.mulf %23, %22 : vector<8x128xf32>
      %c0_13 = arith.constant 0 : index
      %c0_14 = arith.constant 0 : index
      %25 = vector.load %arg9[%c0_13, %c0_14] : memref<8x128xf32, #tpu.memory_space<vmem>>, vector<8x128xf32>
      tpu.vector_store %arg9[%c0_13, %c0_14], %24 {strides = array<i32>} : memref<8x128xf32, #tpu.memory_space<vmem>>, vector<8x128xf32>,
    } else {
    }
    %c8_i32 = arith.constant 8 : i32
    %3 = arith.muli %arg0, %c8_i32 : i32
    %4 = tpu.iota {dimensions = array<i32: 0>} : vector<8x1xi32>
    %5 = vector.broadcast %3 : i32 to vector<8x1xi32>
    %6 = arith.addi %5, %4 : vector<8x1xi32>
    %c0 = arith.constant 0 : index
    %c0_1 = arith.constant 0 : index
    %7 = vector.load %arg4[%c0, %c0_1] : memref<1x128xi32, #tpu.memory_space<vmem>>, vector<1x128xi32>
    %8 = vector.broadcast %6 : vector<8x1xi32> to vector<8x128xi32>
    %9 = vector.broadcast %7 : vector<1x128xi32> to vector<8x128xi32>
    %10 = arith.cmpi eq, %8, %9 : vector<8x128xi32>
    %11 = arith.extui %10 : vector<8x128xi1> to vector<8x128xi32>
    %12 = arith.sitofp %11 : vector<8x128xi32> to vector<8x128xf32>
    %13 = arith.truncf %12 : vector<8x128xf32> to vector<8x128xbf16>
    %c0_2 = arith.constant 0 : index
    %c0_3 = arith.constant 0 : index
    %14 = vector.load %arg9[%c0_2, %c0_3] : memref<8x128xf32, #tpu.memory_space<vmem>>, vector<8x128xf32>
    %c0_4 = arith.constant 0 : index
    %c0_5 = arith.constant 0 : index
    %15 = vector.load %arg3[%c0_4, %c0_5] : memref<128x128xbf16, #tpu.memory_space<vmem>>, vector<128x128xbf16>
    %cst = arith.constant dense<0.000000e+00> : vector<8x128xf32>
    %16 = tpu.matmul %13, %15, %cst {dimension_numbers = #tpu.dot_dimension_numbers<[1], [0], [0], [1], [0, 0, 1, 1], [], []>} : vector<8x128xbf16>, vector<128x128xbf16>, vector<8x128xf32> -> vector<8x128xf32>
    %17 = arith.addf %14, %16 : vector<8x128xf32>
    %c0_6 = arith.constant 0 : index
    %c0_7 = arith.constant 0 : index
    %18 = vector.load %arg9[%c0_6, %c0_7] : memref<8x128xf32, #tpu.memory_space<vmem>>, vector<8x128xf32>
    tpu.vector_store %arg9[%c0_6, %c0_7], %17 {strides = array<i32>} : memref<8x128xf32, #tpu.memory_space<vmem>>, vector<8x128xf32>,
    %c0_i32_8 = arith.constant 0 : i32
    %19 = arith.cmpi eq, %arg1, %c0_i32_8 : i32
    %20 = arith.extui %19 : i1 to i32
    %c0_i32_9 = arith.constant 0 : i32
    %21 = arith.cmpi ne, %20, %c0_i32_9 : i32
    scf.if %21 {
      %c0_10 = arith.constant 0 : index
      %c0_11 = arith.constant 0 : index
      %22 = vector.load %arg9[%c0_10, %c0_11] : memref<8x128xf32, #tpu.memory_space<vmem>>, vector<8x128xf32>
      %23 = arith.truncf %22 : vector<8x128xf32> to vector<8x128xbf16>
      %c0_12 = arith.constant 0 : index
      %c0_13 = arith.constant 0 : index
      %24 = vector.load %arg5[%c0_12, %c0_13] : memref<128x128xbf16, #tpu.memory_space<vmem>>, vector<128x128xbf16>
      %cst_14 = arith.constant dense<0.000000e+00> : vector<8x128xf32>
      %25 = tpu.matmul %23, %24, %cst_14 {dimension_numbers = #tpu.dot_dimension_numbers<[1], [0], [0], [1], [0, 0, 1, 1], [], []>} : vector<8x128xbf16>, vector<128x128xbf16>, vector<8x128xf32> -> vector<8x128xf32>
      %c0_15 = arith.constant 0 : index
      %c0_16 = arith.constant 0 : index
      %26 = vector.load %arg6[%c0_15, %c0_16] : memref<1x128xf32, #tpu.memory_space<vmem>>, vector<1x128xf32>
      %27 = vector.broadcast %26 : vector<1x128xf32> to vector<8x128xf32>
      %28 = arith.addf %25, %27 : vector<8x128xf32>
      %cst_17 = arith.constant 0.000000e+00 : f32
      %29 = vector.broadcast %cst_17 : f32 to vector<8x128xf32>
      %30 = arith.maximumf %28, %29 : vector<8x128xf32>
      %c0_18 = arith.constant 0 : index
      %c0_19 = arith.constant 0 : index
      %31 = vector.load %arg2[%c0_18, %c0_19] : memref<8x128xf32, #tpu.memory_space<vmem>>, vector<8x128xf32>
      %32 = arith.truncf %31 : vector<8x128xf32> to vector<8x128xbf16>
      %c0_20 = arith.constant 0 : index
      %c0_21 = arith.constant 0 : index
      %33 = vector.load %arg7[%c0_20, %c0_21] : memref<128x128xbf16, #tpu.memory_space<vmem>>, vector<128x128xbf16>
      %cst_22 = arith.constant dense<0.000000e+00> : vector<8x128xf32>
      %34 = tpu.matmul %32, %33, %cst_22 {dimension_numbers = #tpu.dot_dimension_numbers<[1], [0], [0], [1], [0, 0, 1, 1], [], []>} : vector<8x128xbf16>, vector<128x128xbf16>, vector<8x128xf32> -> vector<8x128xf32>
      %35 = arith.addf %30, %34 : vector<8x128xf32>
      %c0_23 = arith.constant 0 : index
      %c0_24 = arith.constant 0 : index
      %36 = vector.load %arg8[%c0_23, %c0_24] : memref<8x128xf32, #tpu.memory_space<vmem>>, vector<8x128xf32>
      tpu.vector_store %arg8[%c0_23, %c0_24], %35 {strides = array<i32>} : memref<8x128xf32, #tpu.memory_space<vmem>>, vector<8x128xf32>,
    } else {
    }
    return
  }
  func.func @transform_0(%arg0: i32, %arg1: i32) -> (i32, i32) {
    %c0_i32 = arith.constant 0 : i32
    %c0_i32_0 = arith.constant 0 : i32
    return %arg0, %c0_i32 : i32, i32
  }
  func.func @transform_1(%arg0: i32, %arg1: i32) -> (i32, i32) {
    %c0_i32 = arith.constant 0 : i32
    %c0_i32_0 = arith.constant 0 : i32
    return %arg1, %c0_i32 : i32, i32
  }
  func.func @transform_2(%arg0: i32, %arg1: i32) -> (i32, i32) {
    %c0_i32 = arith.constant 0 : i32
    %c0_i32_0 = arith.constant 0 : i32
    return %c0_i32, %arg1 : i32, i32
  }
  func.func @transform_3(%arg0: i32, %arg1: i32) -> (i32, i32) {
    %c0_i32 = arith.constant 0 : i32
    %c0_i32_0 = arith.constant 0 : i32
    %c0_i32_1 = arith.constant 0 : i32
    return %c0_i32, %c0_i32_0 : i32, i32
  }
  func.func @transform_4(%arg0: i32, %arg1: i32) -> (i32, i32) {
    %c0_i32 = arith.constant 0 : i32
    %c0_i32_0 = arith.constant 0 : i32
    %c0_i32_1 = arith.constant 0 : i32
    return %c0_i32, %c0_i32_0 : i32, i32
  }
  func.func @transform_5(%arg0: i32, %arg1: i32) -> (i32, i32) {
    %c0_i32 = arith.constant 0 : i32
    %c0_i32_0 = arith.constant 0 : i32
    %c0_i32_1 = arith.constant 0 : i32
    return %c0_i32, %c0_i32_0 : i32, i32
  }
  func.func @transform_6(%arg0: i32, %arg1: i32) -> (i32, i32) {
    %c0_i32 = arith.constant 0 : i32
    %c0_i32_0 = arith.constant 0 : i32
    return %arg0, %c0_i32 : i32, i32
  }
}

</mosaic_0001>

<bundles_post_ra>
// kernel: tpu_custom_call.1
= control target key start
LH: loop header
LB: loop body
LE: loop exit
PB: predicated region body
PF: predicated region fallthrough
CT: control target
= control target key end

     0   :  { %11 = vsyncpa [#allocation4], 0  ;;  %s866_s0 = inlined_call_operand.hbm [shape: f32[8,128], index: 0, kind: input, shape index: {}]   ;;  %s867_s1 = inlined_call_operand.hbm [shape: bf16[128,128], index: 1, kind: input, shape index: {}]   ;;  %s868_s2 = inlined_call_operand.vmem [shape: s32[1,128], index: 2, kind: input, shape index: {}]   ;;  %s869_s3 = inlined_call_operand.hbm [shape: bf16[128,128], index: 3, kind: input, shape index: {}]   ;;  %s870_s4 = inlined_call_operand.vmem [shape: f32[1,128], index: 4, kind: input, shape index: {}]   ;;  %s871_s5 = inlined_call_operand.hbm [shape: bf16[128,128], index: 5, kind: input, shape index: {}]   ;;  %s872_s6 = inlined_call_operand.hbm [shape: f32[8,128], index: 6, kind: output, shape index: {}]  }
   0x1   :  { %12 = vsyncpa [#allocation7], 0 }
   0x2   :  { %13 = vsyncpa [#allocation10], 0 }
   0x3   :  { %14 = vsyncpa [#allocation5], 0  ;;  %s716_s21 = smov [#allocation6]   ;;  %s598_s25 = scalar_lea.hbm %s867_s1, 1024 }
   0x4   :  { %s30_s22 = sshll.u32 %s716_s21, 4  ;;  %p599_p0 = scmp.ne.s32.totalorder %s867_s1, %s598_s25  ;;  %s31_s22 = int_to_ptr.vmem [resolvable:$true] %s30_s22 }
   0x5   :  { %p602_p1 = scmp.lt.u32.totalorder %s598_s25, %s867_s1 }
   0x7   :  { %p604_p2 = pnand %p602_p1, %p599_p0 }
   0x9   :  { %607 = shalt.err (!%p604_p2)
}
   0xa   :  { %s608_s30 = scalar_lea.vmem %s31_s22, 1024  ;;  %p613_p4 = scmp.lt.s32.totalorder %s31_s22, %s31_s22 }
   0xb   :  { %p609_p3 = scmp.ne.s32.totalorder %s31_s22, %s608_s30  ;;  %p614_p5 = scmp.lt.s32.totalorder %s608_s30, %s608_s30 }
   0xd   :  { %p615_p6 = por %p614_p5, %p613_p4 }
   0xf   :  { %p616_p7 = pnand %p615_p6, %p609_p3 }
  0x11   :  { %619 = shalt.err (!%p616_p7)
}
  0x12   :  { %s717_s7 = smov 64   ;;  %s718_s8 = smov 4  }
  0x13   :  { %36 = dma.hbm_to_vmem [thread:$0]  %s867_s1, 1024, %s31_s22, [#allocation7], %s717_s7, %s717_s7, %s718_s8  }
  0x14   :  { %s719_s11 = smov [#allocation3]   ;;  %s720_s13 = smov [#allocation8]  }
  0x15   :  { %s21_s12 = sshll.u32 %s719_s11, 4  ;;  %s44_s14 = sshll.u32 %s720_s13, 4  ;;  %s22_s12 = int_to_ptr.vmem [resolvable:$true] %s21_s12  ;;  %s45_s14 = int_to_ptr.vmem [resolvable:$true] %s44_s14 }
  0x16   :  { %s620_s17 = scalar_lea.hbm %s866_s0, 128 }
  0x17   :  { %p621_p8 = scmp.ne.s32.totalorder %s866_s0, %s620_s17  ;;  %p624_p9 = scmp.lt.u32.totalorder %s620_s17, %s866_s0 }
  0x19   :  { %p626_p10 = pnand %p624_p9, %p621_p8 }
  0x1b   :  { %629 = shalt.err (!%p626_p10)
}
  0x1c   :  { %s630_s1 = scalar_lea.vmem %s22_s12, 128  ;;  %p635_p12 = scmp.lt.s32.totalorder %s22_s12, %s22_s12 }
  0x1d   :  { %p631_p11 = scmp.ne.s32.totalorder %s22_s12, %s630_s1  ;;  %p636_p13 = scmp.lt.s32.totalorder %s630_s1, %s630_s1 }
  0x1f   :  { %p637_p0 = por %p636_p13, %p635_p12 }
  0x21   :  { %p638_p1 = pnand %p637_p0, %p631_p11 }
  0x23   :  { %641 = shalt.err (!%p638_p1)
}
  0x24   :  { %24 = dma.hbm_to_vmem [thread:$0]  %s866_s0, 128, %s22_s12, [#allocation4]  }
  0x25   :  { %s642_s26 = scalar_lea.hbm %s869_s3, 1024 }
  0x26   :  { %p643_p2 = scmp.ne.s32.totalorder %s869_s3, %s642_s26  ;;  %p646_p3 = scmp.lt.u32.totalorder %s642_s26, %s869_s3 }
  0x28   :  { %p648_p4 = pnand %p646_p3, %p643_p2 }
  0x2a   :  { %651 = shalt.err (!%p648_p4)
}
  0x2b   :  { %s652_s9 = scalar_lea.vmem %s45_s14, 1024  ;;  %p657_p6 = scmp.lt.s32.totalorder %s45_s14, %s45_s14 }
  0x2c   :  { %p653_p5 = scmp.ne.s32.totalorder %s45_s14, %s652_s9  ;;  %p658_p7 = scmp.lt.s32.totalorder %s652_s9, %s652_s9 }
  0x2e   :  { %p659_p8 = por %p658_p7, %p657_p6 }
  0x30   :  { %p660_p9 = pnand %p659_p8, %p653_p5 }
  0x32   :  { %663 = shalt.err (!%p660_p9)
}
  0x33   :  { %50 = dma.hbm_to_vmem [thread:$0]  %s869_s3, 1024, %s45_s14, [#allocation7], %s717_s7, %s717_s7, %s718_s8  }
  0x34   :  { %s721_s11 = smov [#allocation9]   ;;  %s664_s16 = scalar_lea.hbm %s871_s5, 1024 }
  0x35   :  { %s58_s12 = sshll.u32 %s721_s11, 4  ;;  %p665_p10 = scmp.ne.s32.totalorder %s871_s5, %s664_s16  ;;  %s59_s12 = int_to_ptr.vmem [resolvable:$true] %s58_s12 }
  0x36   :  { %p668_p11 = scmp.lt.u32.totalorder %s664_s16, %s871_s5 }
  0x38   :  { %p670_p12 = pnand %p668_p11, %p665_p10 }
  0x3a   :  { %673 = shalt.err (!%p670_p12)
}
  0x3b   :  { %s674_s21 = scalar_lea.vmem %s59_s12, 1024  ;;  %p679_p0 = scmp.lt.s32.totalorder %s59_s12, %s59_s12 }
  0x3c   :  { %p675_p13 = scmp.ne.s32.totalorder %s59_s12, %s674_s21  ;;  %p680_p1 = scmp.lt.s32.totalorder %s674_s21, %s674_s21 }
  0x3e   :  { %p681_p2 = por %p680_p1, %p679_p0 }
  0x40   :  { %p682_p3 = pnand %p681_p2, %p675_p13 }
  0x42   :  { %685 = shalt.err (!%p682_p3)
}
  0x43   :  { %64 = dma.hbm_to_vmem [thread:$0]  %s871_s5, 1024, %s59_s12, [#allocation10], %s717_s7, %s717_s7, %s718_s8  }
  0x44   :  { %708 = dma.done.wait [#allocation4], 128  }
  0x45   :  { %709 = vsyncadd [#allocation4], 4294967168 }
  0x46   :  { %710 = dma.done.wait [#allocation7], 2048  }
  0x47   :  { %711 = vsyncadd [#allocation7], 4294965248 }
  0x48   :  { %712 = dma.done.wait [#allocation10], 1024  }
  0x49   :  { %713 = vsyncadd [#allocation10], 4294966272  ;;  %v722_v0 = vmov 0.0   ;;  %vm723_vm0 = vmmov 0   ;;  %v574_v1 = vld [vmem:[#allocation6] sm:$0xff]   ;;  %v575_v2 = vld [vmem:[#allocation6 + $0x8] sm:$0xff]   ;;  %v86_v10 = vlaneseq }
  0x4a   :  { %504 = vmatprep.subr.bf16.mxu0 %v722_v0  ;;  %520 = vmatprep.mubr.msk.bf16.mxu0 %vm723_vm0, %v722_v0  ;;  %v576_v3 = vld [vmem:[#allocation6 + $0x10] sm:$0xff]   ;;  %v582_v4 = vld [vmem:[#allocation8] sm:$0xff]   ;;  %v577_v5 = vld [vmem:[#allocation6 + $0x18] sm:$0xff]   ;;  %v724_v20 = vmov 1.0|1.0   ;;  %s725_s1 = smov [#allocation11]  }
  0x4b   :  { %524 = vmatprep.subr.bf16.mxu1 %v722_v0  ;;  %540 = vmatprep.mubr.msk.bf16.mxu1 %vm723_vm0, %v722_v0  ;;  %v584_v6 = vld [vmem:[#allocation8 + $0x8] sm:$0xff]   ;;  %v578_v7 = vld [vmem:[#allocation6 + $0x20] sm:$0xff]   ;;  %v586_v8 = vld [vmem:[#allocation8 + $0x10] sm:$0xff]   ;;  %v87_v13 = vshrl.u32 %v86_v10, 7  ;;  %s437_s22 = sshll.u32 %s725_s1, 4  ;;  %s438_s22 = int_to_ptr.vmem [resolvable:$true] %s437_s22 }
  0x4c   :  { %505 = vmatpush3.bf16.msra.mxu0 %v574_v1  ;;  %525 = vmatpush3.bf16.msra.mxu1 %v582_v4  ;;  %v579_v9 = vld [vmem:[#allocation6 + $0x28] sm:$0xff]   ;;  %v588_v11 = vld [vmem:[#allocation8 + $0x18] sm:$0xff]   ;;  %v580_v12 = vld [vmem:[#allocation6 + $0x30] sm:$0xff]   ;;  %s686_s23 = scalar_lea.vmem %s438_s22, 128  ;;  %p691_p5 = scmp.lt.s32.totalorder %s438_s22, %s438_s22 }
  0x4d   :  { %506 = vmatprep.subr.bf16.mxu0 %v722_v0  ;;  %526 = vmatprep.subr.bf16.mxu1 %v722_v0  ;;  %v590_v14 = vld [vmem:[#allocation8 + $0x20] sm:$0xff]   ;;  %v448_v15 = vld [vmem:[%s868_s2] ss:$0 sm:$0xff]  ;;  %v592_v17 = vld [vmem:[#allocation8 + $0x28] sm:$0xff]   ;;  %p687_p4 = scmp.ne.s32.totalorder %s438_s22, %s686_s23  ;;  %p692_p6 = scmp.lt.s32.totalorder %s686_s23, %s686_s23 }
  0x4e   :  { %v581_v16 = vld [vmem:[#allocation6 + $0x38] sm:$0xff]   ;;  %vm95_vm1 = vcmp.eq.s32.totalorder %v87_v13, %v448_v15  ;;  %v583_v18 = vld [vmem:[#allocation9] sm:$0xff]   ;;  %v594_v19 = vld [vmem:[#allocation8 + $0x30] sm:$0xff]  }
  0x4f   :  { %vm458_vm2 = vmpackc.low %vm95_vm1, %vm95_vm1  ;;  %v585_v21 = vld [vmem:[#allocation9 + $0x8] sm:$0xff]   ;;  %v587_v22 = vld [vmem:[#allocation9 + $0x10] sm:$0xff]   ;;  %p693_p7 = por %p692_p6, %p691_p5 }
  0x50   :  { %507 = vmatpush3.bf16.msra.mxu0 %v575_v2  ;;  %527 = vmatpush3.bf16.msra.mxu1 %v584_v6  ;;  %v589_v23 = vld [vmem:[#allocation9 + $0x18] sm:$0xff]   ;;  %v591_v24 = vld [vmem:[#allocation9 + $0x20] sm:$0xff]   ;;  %v593_v25 = vld [vmem:[#allocation9 + $0x28] sm:$0xff]  }
  0x51   :  { %508 = vmatprep.subr.bf16.mxu0 %v722_v0  ;;  %528 = vmatprep.subr.bf16.mxu1 %v722_v0  ;;  %v595_v26 = vld [vmem:[#allocation9 + $0x30] sm:$0xff]   ;;  %v596_v27 = vld [vmem:[#allocation8 + $0x38] sm:$0xff]   ;;  %p694_p8 = pnand %p693_p7, %p687_p4 }
  0x52   :  { %v597_v28 = vld [vmem:[#allocation9 + $0x38] sm:$0xff]  }
  0x53   :  { %v82_v29 = vld [vmem:[#allocation3] sm:$0xff] }
  0x54   :  { %509 = vmatpush3.bf16.msra.mxu0 %v576_v3  ;;  %529 = vmatpush3.bf16.msra.mxu1 %v586_v8  ;;  %v324_v30 = vpack.c.bf16 %v82_v29, %v82_v29  ;;  %v83_v31 = vmul.f32 1.00001, %v82_v29  ;;  %v460_v42 = vld [vmem:[%s870_s4] ss:$0 sm:$0xff] }
  0x55   :  { %510 = vmatprep.subr.bf16.mxu0 %v722_v0  ;;  %530 = vmatprep.subr.bf16.mxu1 %v722_v0 }
  0x58   :  { %511 = vmatpush3.bf16.msra.mxu0 %v577_v5  ;;  %531 = vmatpush3.bf16.msra.mxu1 %v588_v11 }
  0x59   :  { %512 = vmatprep.subr.bf16.mxu0 %v722_v0  ;;  %532 = vmatprep.subr.bf16.mxu1 %v722_v0 }
  0x5c   :  { %513 = vmatpush3.bf16.msra.mxu0 %v578_v7  ;;  %533 = vmatpush3.bf16.msra.mxu1 %v590_v14 }
  0x5d   :  { %514 = vmatprep.subr.bf16.mxu0 %v722_v0  ;;  %534 = vmatprep.subr.bf16.mxu1 %v722_v0 }
  0x60   :  { %515 = vmatpush3.bf16.msra.mxu0 %v579_v9  ;;  %535 = vmatpush3.bf16.msra.mxu1 %v592_v17 }
  0x61   :  { %516 = vmatprep.subr.bf16.mxu0 %v722_v0  ;;  %536 = vmatprep.subr.bf16.mxu1 %v722_v0 }
  0x64   :  { %517 = vmatpush3.bf16.msra.mxu0 %v580_v12  ;;  %537 = vmatpush3.bf16.msra.mxu1 %v594_v19 }
  0x65   :  { %518 = vmatprep.subr.bf16.mxu0 %v722_v0  ;;  %538 = vmatprep.subr.bf16.mxu1 %v722_v0 }
  0x68   :  { %519 = vmatpush3.bf16.msra.mxu0 %v581_v16  ;;  %539 = vmatpush3.bf16.msra.mxu1 %v596_v27 }
  0x69   :  { %544 = vmatprep.subr.bf16.mxu0 %v722_v0 }
  0x6b   :  { %521 = vmatmul.mubr.msk.bf16.vlgmr.msra.gmra.mrb[0].mxu0 %vm458_vm2, %v724_v20 }
  0x6c   :  { %545 = vmatpush3.bf16.msra.mxu0 %v583_v18  ;;  %560 = vmatprep.mubr.msk.bf16.mxu0 %vm723_vm0, %v722_v0 }
  0x6d   :  { %546 = vmatprep.subr.bf16.mxu0 %v722_v0 }
  0x70   :  { %547 = vmatpush3.bf16.msra.mxu0 %v585_v21 }
  0x71   :  { %548 = vmatprep.subr.bf16.mxu0 %v722_v0 }
  0x74   :  { %549 = vmatpush3.bf16.msra.mxu0 %v587_v22 }
  0x75   :  { %550 = vmatprep.subr.bf16.mxu0 %v722_v0 }
  0x78   :  { %551 = vmatpush3.bf16.msra.mxu0 %v589_v23 }
  0x79   :  { %552 = vmatprep.subr.bf16.mxu0 %v722_v0 }
  0x7c   :  { %553 = vmatpush3.bf16.msra.mxu0 %v591_v24 }
  0x7d   :  { %554 = vmatprep.subr.bf16.mxu0 %v722_v0 }
  0x80   :  { %555 = vmatpush3.bf16.msra.mxu0 %v593_v25 }
  0x81   :  { %556 = vmatprep.subr.bf16.mxu0 %v722_v0 }
  0x84   :  { %557 = vmatpush3.bf16.msra.mxu0 %v595_v26 }
  0x85   :  { %558 = vmatprep.subr.bf16.mxu0 %v722_v0 }
  0x88   :  { %559 = vmatpush3.bf16.msra.mxu0 %v597_v28 }
  0x8b   :  { %561 = vmatmul.mubr.bf16.vlgmr.msra.gmra.mrb[4].mxu0 %v324_v30 }
 0x13e   :  { %v198_v32 = vpop.f32.mrb[0].mxu0 }
 0x13f   :  { %v204_v33 = vadd.f32 %v198_v32, %v83_v31  ;;  %v522_v34 = vpop.f32.mrb[1].mxu0 }
 0x140   :  { %v201_v35 = vpop.f32.mrb[2].mxu0 }
 0x141   :  { %v210_v36 = vpack.c.bf16 %v204_v33, %v204_v33  ;;  %v523_v37 = vpop.f32.mrb[3].mxu0 }
 0x143   :  { %541 = vmatmul.mubr.bf16.vlgmr.msra.gmra.mrb[0].mxu1 %v210_v36 }
 0x15e   :  { %v423_v38 = vpop.f32.mrb[4].mxu0 }
 0x15f   :  { %v562_v39 = vpop.f32.mrb[5].mxu0 }
 0x160   :  { %v426_v40 = vpop.f32.mrb[6].mxu0 }
 0x161   :  { %v563_v41 = vpop.f32.mrb[7].mxu0 }
 0x216   :  { %v316_v43 = vpop.f32.mrb[0].mxu1 }
 0x217   :  { %v317_v44 = vadd.f32 %v460_v42, %v316_v43  ;;  %v542_v45 = vpop.f32.mrb[1].mxu1 }
 0x218   :  { %v319_v46 = vpop.f32.mrb[2].mxu1 }
 0x219   :  { %v322_v47 = vmax.f32 %v317_v44, 0.0  ;;  %v543_v48 = vpop.f32.mrb[3].mxu1 }
 0x21b   :  { %v429_v49 = vadd.f32 %v423_v38, %v322_v47 }
 0x21d   :  { %430 = vst [vmem:[#allocation11] sm:$0xff] %v429_v49 }
 0x21e   :  { %697 = shalt.err (!%p694_p8)
}
 0x21f   :  { %s698_s25 = scalar_lea.hbm %s872_s6, 128 }
 0x220   :  { %p699_p9 = scmp.ne.s32.totalorder %s872_s6, %s698_s25  ;;  %p702_p10 = scmp.lt.u32.totalorder %s698_s25, %s872_s6 }
 0x222   :  { %p704_p11 = pnand %p702_p10, %p699_p9 }
 0x224   :  { %707 = shalt.err (!%p704_p11)
}
 0x225   :  { %440 = dma.vmem_to_hbm [thread:$0]  %s438_s22, 128, %s872_s6, [#allocation5]  }
 0x226   :  { %714 = dma.done.wait [#allocation5], 128  }
 0x227   :  { %715 = vsyncadd [#allocation5], 4294967168 }
 0x228   :  { %444 = vsyncpa [#allocation4], 1 }
 0x229   :  { %445 = vsyncpa [#allocation7], 1 }
 0x22a   :  { %446 = vsyncpa [#allocation10], 1 }
 0x22b   :  { %447 = vsyncpa [#allocation5], 1 }

</bundles_post_ra>
